<compile_context>
chip_gen: v5e
topology: v5e:2x2
jax: 0.10.0
libtpu: 0.0.40
codegen_flags: <defaults>
</compile_context>

<pallas_src>
import functools

import jax
import jax.numpy as jnp
import numpy as np
from jax import lax
from jax.experimental import pallas as pl
from jax.experimental.pallas import tpu as pltpu


def rpe_kernel(coords_ref, table_ref, out_ref, *, grid_size, max_len, nhead):
    # coords_ref: (3, T) f32, table_ref: (2*nhead, Lp) f32, out_ref: (nhead, T) f32
    c = coords_ref[...]                                   # (3, T)
    x = c[0:1, :]
    y = c[1:2, :]
    z = c[2:3, :]
    # sqrt -> EUP; divide by grid_size exactly as the reference does.
    dist = jnp.sqrt(x * x + y * y + z * z) / grid_size    # (1, T)

    # torch .long() truncates toward zero; dist >= 0 so truncation == floor.
    idx1 = dist.astype(jnp.int32)                         # (1, T)
    i1f = idx1.astype(jnp.float32)

    # Weights from the UNclamped index (matches the PyTorch op order).
    w1 = (i1f + 1.0) - dist                               # (1, T)
    w2 = dist - i1f                                       # (1, T)

    # Clamp idx1 only; the shifted half of the pair table handles idx2's clamp.
    idx1c = jnp.minimum(idx1, max_len - 1)                # (1, T)

    Lp = table_ref.shape[1]
    T = coords_ref.shape[1]

    # Unweighted one-hot: oh[l, t] = 1.0 iff l == idx1c[t].
    row = lax.broadcasted_iota(jnp.int32, (Lp, T), 0)     # (Lp, T)
    oh = jnp.where(row == idx1c, 1.0, 0.0)                # (Lp, T) f32

    # Single MXU matmul performs both gathers at once:
    #   (2H, Lp) @ (Lp, T) -> (2H, T);  rows [:H] = W[idx1c], rows [H:] = W[idx2c].
    # Exact {0,1} one-hot => gather is exact under any f32 MXU pass scheme.
    g = jnp.dot(table_ref[...], oh, preferred_element_type=jnp.float32)

    out_ref[...] = (g[:nhead, :] * w1 + g[nhead:, :] * w2).astype(out_ref.dtype)


def rpe_forward(batch_rel_coords, pos_embed_weight, grid_size, max_len, *, tile=2048):
    """batch_rel_coords: (B, N, 3) -> (B, N, nhead)."""
    B, N, _ = batch_rel_coords.shape
    nhead = pos_embed_weight.shape[1]
    max_len = int(max_len)

    M = B * N
    # Large tile to amortize per-grid-step overhead, but cap so that the grid
    # has at least 2 steps when M allows (keeps both v7x TensorCores busy).
    half = pl.cdiv(pl.cdiv(M, 2), 128) * 128
    tile = max(128, min(int(tile), half))
    Mp = pl.cdiv(M, tile) * tile

    # Coords transposed to (3, Mp): lane-dense per-row scalars inside the kernel.
    coords_t = batch_rel_coords.reshape(M, 3).astype(jnp.float32).T   # (3, M)
    coords_t = jnp.pad(coords_t, ((0, 0), (0, Mp - M)))

    # Pair table: columns [:nhead] = W, columns [nhead:] = W shifted by one row
    # (edge-padded), so a single one-hot on clamped idx1 gathers both
    # W[idx1_clamped] and W[idx2_clamped] in one matmul.
    W = pos_embed_weight.astype(jnp.float32)                          # (max_len, H)
    W_shift = jnp.concatenate([W[1:], W[-1:]], axis=0)                # (max_len, H)
    pair = jnp.concatenate([W, W_shift], axis=1)                      # (max_len, 2H)

    # Length only needs a multiple of 8 >= max_len (indices are <= max_len-1);
    # zero padding is never selected by the one-hot.
    Lp = pl.cdiv(max_len, 8) * 8
    pair = jnp.pad(pair, ((0, Lp - max_len), (0, 0)))                 # (Lp, 2H)
    table_t = pair.T                                                  # (2H, Lp)

    kernel = functools.partial(rpe_kernel,
                               grid_size=float(grid_size),
                               max_len=max_len,
                               nhead=nhead)

    out_t = pl.pallas_call(
        kernel,
        out_shape=jax.ShapeDtypeStruct((nhead, Mp), jnp.float32),
        grid_spec=pltpu.PrefetchScalarGridSpec(
            num_scalar_prefetch=0,
            grid=(Mp // tile,),
            in_specs=[
                pl.BlockSpec((3, tile), lambda i: (0, i)),
                pl.BlockSpec((2 * nhead, Lp), lambda i: (0, 0)),
            ],
            out_specs=pl.BlockSpec((nhead, tile), lambda i: (0, i)),
        ),
        compiler_params=pltpu.CompilerParams(
            dimension_semantics=("parallel",)),
    )(coords_t, table_t)

    # Padded columns hold garbage (they gathered row 0 with dist=0); slice off.
    return out_t[:, :M].T.reshape(B, N, nhead)


def rpe_reference(batch_rel_coords, pos_embed_weight, grid_size, max_len):
    """Plain-JAX reference mirroring the PyTorch forward exactly."""
    dist = jnp.linalg.norm(batch_rel_coords.astype(jnp.float32), axis=-1)
    dist = dist / grid_size
    idx1 = dist.astype(jnp.int32)
    idx2 = idx1 + 1
    w1 = idx2.astype(dist.dtype) - dist
    w2 = dist - idx1.astype(dist.dtype)
    idx1 = jnp.where(idx1 >= max_len, max_len - 1, idx1)
    idx2 = jnp.where(idx2 >= max_len, max_len - 1, idx2)
    e1 = jnp.take(pos_embed_weight, idx1, axis=0)
    e2 = jnp.take(pos_embed_weight, idx2, axis=0)
    return e1 * w1[..., None] + e2 * w2[..., None]


if __name__ == "__main__":
    # Module hyperparameters (matching RPE.__init__ semantics).
    nhead = 8
    quan_size = 0.02
    point_cloud_range = np.array([0.0, 0.0, 0.0, 2.0, 2.0, 2.0])
    rng_extent = point_cloud_range[3:6] - point_cloud_range[0:3]
    rng_norm = float((rng_extent ** 2).sum() ** 0.5)
    max_len = int(rng_norm // quan_size + 1)   # == 174 for this range

    # Deterministic parameter init (nn.init.uniform_ -> U[0,1)).
    key = jax.random.PRNGKey(0)
    k_w, k_x = jax.random.split(key)
    pos_embed_weight = jax.random.uniform(k_w, (max_len, nhead), dtype=jnp.float32)

    # Example input: (B, N, 3) relative coords, well inside the range.
    B, N = 2, 200
    batch_rel_coords = jax.random.uniform(
        k_x, (B, N, 3), dtype=jnp.float32, minval=-1.0, maxval=1.0)

    out = rpe_forward(batch_rel_coords, pos_embed_weight, quan_size, max_len)
    out = jax.block_until_ready(out)

    ref = rpe_reference(batch_rel_coords, pos_embed_weight, quan_size, max_len)
    np.testing.assert_allclose(np.asarray(out), np.asarray(ref),
                               rtol=1e-5, atol=1e-5)
    assert out.shape == (B, N, nhead)

    print("KERNEL_OK")
</pallas_src>

<mosaic_0001>
module attributes {stable_mosaic.version = 11 : i64} {
  func.func @rpe_kernel(%arg0: i32, %arg1: memref<3x256xf32, #tpu.memory_space<vmem>>, %arg2: memref<16x176xf32, #tpu.memory_space<vmem>>, %arg3: memref<8x256xf32, #tpu.memory_space<vmem>>) attributes {dimension_semantics = [#tpu.dimension_semantics<parallel>], iteration_bounds = array<i64: 2>, scalar_prefetch = 0 : i64, scratch_operands = 0 : i64, tpu.core_type = #tpu.core_type<tc>, window_params = [{transform_indices = @transform_0, window_bounds = array<i64: 3, 256>}, {pipeline_mode = #tpu.pipeline_mode<synchronous>, transform_indices = @transform_1, window_bounds = array<i64: 16, 176>}, {transform_indices = @transform_2, window_bounds = array<i64: 8, 256>}]} {
    %c0 = arith.constant 0 : index
    %c0_0 = arith.constant 0 : index
    %0 = vector.load %arg1[%c0, %c0_0] : memref<3x256xf32, #tpu.memory_space<vmem>>, vector<3x256xf32>
    %1 = vector.extract_strided_slice %0 {offsets = [0, 0], sizes = [1, 256], strides = [1, 1]} : vector<3x256xf32> to vector<1x256xf32>
    %2 = vector.extract_strided_slice %0 {offsets = [1, 0], sizes = [1, 256], strides = [1, 1]} : vector<3x256xf32> to vector<1x256xf32>
    %3 = vector.extract_strided_slice %0 {offsets = [2, 0], sizes = [1, 256], strides = [1, 1]} : vector<3x256xf32> to vector<1x256xf32>
    %4 = arith.mulf %1, %1 : vector<1x256xf32>
    %5 = arith.mulf %2, %2 : vector<1x256xf32>
    %6 = arith.addf %4, %5 : vector<1x256xf32>
    %7 = arith.mulf %3, %3 : vector<1x256xf32>
    %8 = arith.addf %6, %7 : vector<1x256xf32>
    %9 = math.sqrt %8 : vector<1x256xf32>
    %cst = arith.constant 2.000000e-02 : f32
    %10 = vector.broadcast %cst : f32 to vector<1x256xf32>
    %11 = arith.divf %9, %10 : vector<1x256xf32>
    %12 = arith.fptosi %11 : vector<1x256xf32> to vector<1x256xi32>
    %13 = arith.sitofp %12 : vector<1x256xi32> to vector<1x256xf32>
    %cst_1 = arith.constant 1.000000e+00 : f32
    %14 = vector.broadcast %cst_1 : f32 to vector<1x256xf32>
    %15 = arith.addf %13, %14 : vector<1x256xf32>
    %16 = arith.subf %15, %11 : vector<1x256xf32>
    %17 = arith.subf %11, %13 : vector<1x256xf32>
    %c173_i32 = arith.constant 173 : i32
    %18 = vector.broadcast %c173_i32 : i32 to vector<1x256xi32>
    %19 = arith.minsi %12, %18 : vector<1x256xi32>
    %20 = tpu.iota {dimensions = array<i32: 0>} : vector<176x256xi32>
    %21 = vector.broadcast %19 : vector<1x256xi32> to vector<176x256xi32>
    %22 = arith.cmpi eq, %20, %21 : vector<176x256xi32>
    %cst_2 = arith.constant 1.000000e+00 : f32
    %cst_3 = arith.constant 0.000000e+00 : f32
    %23 = vector.broadcast %cst_2 : f32 to vector<176x256xf32>
    %24 = vector.broadcast %cst_3 : f32 to vector<176x256xf32>
    %25 = arith.select %22, %23, %24 : vector<176x256xi1>, vector<176x256xf32>
    %c0_4 = arith.constant 0 : index
    %c0_5 = arith.constant 0 : index
    %26 = vector.load %arg2[%c0_4, %c0_5] : memref<16x176xf32, #tpu.memory_space<vmem>>, vector<16x176xf32>
    %cst_6 = arith.constant dense<0.000000e+00> : vector<16x256xf32>
    %27 = tpu.matmul %26, %25, %cst_6 {dimension_numbers = #tpu.dot_dimension_numbers<[1], [0], [0], [1], [0, 0, 1, 1], [], []>} : vector<16x176xf32>, vector<176x256xf32>, vector<16x256xf32> -> vector<16x256xf32>
    %28 = vector.extract_strided_slice %27 {offsets = [0, 0], sizes = [8, 256], strides = [1, 1]} : vector<16x256xf32> to vector<8x256xf32>
    %29 = vector.broadcast %16 : vector<1x256xf32> to vector<8x256xf32>
    %30 = arith.mulf %28, %29 : vector<8x256xf32>
    %31 = vector.extract_strided_slice %27 {offsets = [8, 0], sizes = [8, 256], strides = [1, 1]} : vector<16x256xf32> to vector<8x256xf32>
    %32 = vector.broadcast %17 : vector<1x256xf32> to vector<8x256xf32>
    %33 = arith.mulf %31, %32 : vector<8x256xf32>
    %34 = arith.addf %30, %33 : vector<8x256xf32>
    %c0_7 = arith.constant 0 : index
    %c0_8 = arith.constant 0 : index
    %35 = vector.load %arg3[%c0_7, %c0_8] : memref<8x256xf32, #tpu.memory_space<vmem>>, vector<8x256xf32>
    tpu.vector_store %arg3[%c0_7, %c0_8], %34 {strides = array<i32>} : memref<8x256xf32, #tpu.memory_space<vmem>>, vector<8x256xf32>,
    return
  }
  func.func @transform_0(%arg0: i32) -> (i32, i32) {
    %c0_i32 = arith.constant 0 : i32
    %c0_i32_0 = arith.constant 0 : i32
    return %c0_i32, %arg0 : i32, i32
  }
  func.func @transform_1(%arg0: i32) -> (i32, i32) {
    %c0_i32 = arith.constant 0 : i32
    %c0_i32_0 = arith.constant 0 : i32
    %c0_i32_1 = arith.constant 0 : i32
    return %c0_i32, %c0_i32_0 : i32, i32
  }
  func.func @transform_2(%arg0: i32) -> (i32, i32) {
    %c0_i32 = arith.constant 0 : i32
    %c0_i32_0 = arith.constant 0 : i32
    return %c0_i32, %arg0 : i32, i32
  }
}

</mosaic_0001>

<bundles_post_ra>
// kernel: tpu_custom_call.1
= control target key start
LH: loop header
LB: loop body
LE: loop exit
PB: predicated region body
PF: predicated region fallthrough
CT: control target
= control target key end

     0   :  { %7 = vsyncpa [#allocation3], 0  ;;  %s1124_s0 = inlined_call_operand.hbm [shape: f32[3,512], index: 0, kind: input, shape index: {}]   ;;  %s1125_s1 = inlined_call_operand.hbm [shape: f32[16,176], index: 1, kind: input, shape index: {}]   ;;  %s1126_s2 = inlined_call_operand.hbm [shape: f32[8,512], index: 2, kind: output, shape index: {}]  }
   0x1   :  { %9 = vsyncpa [#allocation3 + $0x1], 0 }
   0x2   :  { %10 = vsyncpa [#allocation6], 0 }
   0x3   :  { %11 = vsyncpa [#allocation4], 0 }
   0x4   :  { %13 = vsyncpa [#allocation4 + $0x1], 0  ;;  %s846_s9 = smov 0   ;;  %s848_s10 = smov 0  }
   0x5   :  { %s850_s11 = smov 0   ;;  %s852_s12 = smov 0  }
   0x6 LB: > { %s108_s15 = sshll.u32 %s1125_s1, 4  ;;  %s870_s16 = sadd.s32 4294967295, %s824_s12   ;;  %s824_s12 = sphi %s852_s12, %s1136_s12   ;;  %s820_s11 = sphi %s850_s11, %s1135_s11   ;;  %s816_s10 = sphi %s848_s10, %s1134_s10   ;;  %s812_s9 = sphi %s846_s9, %s1133_s9   ;;  %s109_s15 = int_to_ptr.hbm [resolvable:$true] %s108_s15 }
   0x7   : > { %p557_p0 = scmp.ge.s32.totalorder %s824_s12, 1  ;;  %p40_p1 = scmp.eq.s32.totalorder %s870_s16, 0 }
   0x8   : > { %p97_p2 = scmp.lt.s32.totalorder %s824_s12, 3  ;;  %s826_s18 = smov [#allocation5]  }
   0x9   : > { %s110_s19 = sshll.u32 %s826_s18, 4  ;;  %s827_s20 = smov 256   ;;  %s111_s19 = int_to_ptr.vmem [resolvable:$true] %s110_s19 }
   0xa   : > { %p875_p3 = pnand %p557_p0, %p97_p2  ;;  %s828_s21 = smov 16  }
   0xb   : > { %s556_s22 = sadd.s32 4294967294, %s824_s12   ;;  %s886_s23 = sadd.s32 1, %s824_s12  }
   0xc   : > { %p637_p4 = pneg %p875_p3  ;;  %s26_s24 = sadd.s32 1, %s820_s11 }
   0xd   : > { %s23_s25 = ssub.s32 %s824_s12, %s886_s23  ;;  %p33_p7 = scmp.ne.s32.totalorder %s820_s11, %s816_s10 }
   0xe   : > { %p638_p6 = pnand %p637_p4, %p40_p1  ;;  %p24_p8 = scmp.eq.s32.totalorder %s23_s25, 0 }
   0xf   : > { %p34_p9 = scmp.eq.s32.totalorder %s824_s12, 0  ;;  %p39_p10 = scmp.ne.s32.totalorder %s816_s10, %s812_s9 }
  0x10   : > { %640 = dma.hbm_to_vmem [thread:$0]  (!%p638_p6), %s109_s15, 512, %s111_s19, [#allocation6], %s827_s20, %s827_s20, %s828_s21  }
  0x11   : > { %p84_p11 = scmp.eq.s32.totalorder %s870_s16, 1  ;;  %p902_p12 = por %p40_p1, %p39_p10 }
  0x12   : > { %s898_s26 = scalar_select %p24_p8, %s820_s11, %s26_s24  }
  0x13   : > { %p906_p13 = por %p84_p11, %p33_p7  ;;  %p90_p0 = scmp.eq.s32.totalorder %s556_s22, 1 }
  0x14   : > { %p35_p2 = por %p34_p9, %p33_p7  ;;  %s124_s29 = sand.u32 1, %s820_s11  }
  0x15   : > { %p911_p4 = por %p90_p0, %p39_p10  ;;  %p650_p6 = scmp.lt.s32.totalorder %s824_s12, 2 }
  0x16   : > { %s560_s3 = sshll.u32 %s124_s29, 3  ;;  %s622_s4 = sshll.u32 %s824_s12, 3 }
  0x17   : > { %s133_s7 = scalar_lea.hbm %s1124_s0, %s622_s4  ;;  %s128_s13 = scalar_lea.vmem [#allocation2], %s560_s3 }
  0x18   : > { %s135_s8 = sshll.u32 %s133_s7, 4  ;;  %s137_s14 = sshll.u32 %s128_s13, 4  ;;  %s136_s8 = int_to_ptr.hbm [resolvable:$true] %s135_s8  ;;  %s138_s14 = int_to_ptr.vmem [resolvable:$true] %s137_s14 }
  0x19   : > { %p920_p8 = pnand %p650_p6, %p35_p2  ;;  %s125_s18 = scalar_lea.sflag [#allocation3], %s124_s29 }
  0x1a   : > { %s724_s19 = sshra.s32 %s136_s8, 4  ;;  %s731_s24 = scalar_lea.hbm %s1124_s0, 16  ;;  %s725_s19 = int_to_ptr.hbm [resolvable:$true] %s724_s19 }
  0x1b   : > { %s726_s20 = scalar_lea.hbm %s725_s19, 8  ;;  %p728_p9 = pneg %p920_p8 }
  0x1c   : > { %p727_p7 = scmp.ne.s32.totalorder %s725_s19, %s726_s20  ;;  %p732_p0 = scmp.lt.s32.totalorder %s725_s19, %s1124_s0 }
  0x1d   : > { %p733_p2 = scmp.lt.s32.totalorder %s731_s24, %s726_s20 }
  0x1e   : > { %p729_p10 = pnand %p728_p9, %p727_p7 }
  0x1f   : > { %p734_p6 = por %p733_p2, %p732_p0 }
  0x20   : > { %p730_p11 = pneg %p729_p10 }
  0x22   : > { %p735_p5 = pnand %p734_p6, %p730_p11 }
  0x24   : > { %738 = shalt.err (!%p735_p5)
}
  0x25   : > { %644 = dma.hbm_to_vmem [thread:$0]  (!%p920_p8), %s136_s8, 128, %s138_s14, %s125_s18  }
  0x26   : > { %146 = sbr.rel (%p875_p3) target bundleno = 270 (0x10e), region = 28  ;;  %s937_s29 = sand.u32 (!%p875_p3), 1, %s816_s10  }
  0x27   : > { %s564_s4 = sshll.u32 (!%p875_p3), %s937_s29, 3  ;;  %s149_s5 = scalar_lea.sflag (!%p875_p3), [#allocation3], %s937_s29 }
  0x28   : > { %s152_s6 = scalar_lea.vmem (!%p875_p3), [#allocation2], %s564_s4 }
  0x2b   : > { %799 = dma.done.wait (%p902_p12), %s149_s5, 128  }
  0x2c   : > { %801 = vsyncadd (%p902_p12), %s149_s5, 4294967168 }
  0x2d   : > { %803 = dma.done.wait (%p40_p1), [#allocation6], 512  }
  0x2e   : > { %805 = vsyncadd (%p40_p1), [#allocation6], 4294966784  ;;  %v181_v0 = vld [vmem:[%s152_s6] sm:$0x77]  ;;  %v829_v2 = vmov 0.02   ;;  %v219_v24 = vlaneseq }
  0x2f   : > { %v182_v1 = vmul.f32 %v181_v0, %v181_v0  ;;  %690 = vrcp.f32 %v829_v2  ;;  %v830_v39 = vmov 1.0   ;;  %v335_v54 = vld [vmem:[#allocation5 + $0x8] sm:$0xff]  ;;  %v337_v58 = vld [vmem:[#allocation5 + $0x18] sm:$0xff]  ;;  %v334_v59 = vld [vmem:[#allocation5] sm:$0xff]  ;;  %s566_s17 = sshll.u32 %s937_s29, 4  ;;  %s623_s27 = sshll.u32 %s870_s16, 4 }
  0x30   : > { %v956_v29 = vshrl.u32 %v219_v24, 7  ;;  %v336_v60 = vld [vmem:[#allocation5 + $0x10] sm:$0xff]  ;;  %s471_s13 = scalar_lea.hbm %s1126_s2, %s623_s27  ;;  %s178_s14 = scalar_lea.vmem [#allocation7], %s566_s17 }
  0x31   : > { %v567_v3 = vrot.slane %v182_v1, 9  ;;  %v568_v4 = vrot.slane %v182_v1, 10  ;;  %s473_s15 = sshll.u32 %s178_s14, 4  ;;  %s475_s18 = sshll.u32 %s471_s13, 4  ;;  %s474_s15 = int_to_ptr.vmem [resolvable:$true] %s473_s15  ;;  %s476_s18 = int_to_ptr.hbm [resolvable:$true] %s475_s18 }
  0x32   : > { %v235_v33 = vadd.s32 120, %v956_v29  ;;  %v234_v34 = vadd.s32 112, %v956_v29  ;;  %v233_v37 = vadd.s32 104, %v956_v29  ;;  %v232_v38 = vadd.s32 96, %v956_v29  ;;  %s460_s16 = scalar_lea.sflag [#allocation4], %s937_s29  ;;  %s768_s19 = sshra.s32 %s476_s18, 4  ;;  %s769_s19 = int_to_ptr.hbm [resolvable:$true] %s768_s19 }
  0x33   : > { %v187_v5 = vadd.f32 %v567_v3, %v182_v1  ;;  %v231_v40 = vadd.s32 88, %v956_v29  ;;  %v241_v41 = vadd.s32 168, %v956_v29  ;;  %v240_v42 = vadd.s32 160, %v956_v29  ;;  %s770_s20 = scalar_lea.hbm %s769_s19, 16  ;;  %s774_s24 = scalar_lea.hbm %s1126_s2, 32 }
  0x34   : > { %v230_v43 = vadd.s32 80, %v956_v29  ;;  %v229_v44 = vadd.s32 72, %v956_v29  ;;  %v239_v45 = vadd.s32 152, %v956_v29  ;;  %v238_v46 = vadd.s32 144, %v956_v29  ;;  %p771_p1 = scmp.ne.s32.totalorder %s769_s19, %s770_s20  ;;  %p775_p12 = scmp.lt.s32.totalorder %s769_s19, %s1126_s2 }
  0x35   : > { %v191_v6 = vadd.f32 %v568_v4, %v187_v5  ;;  %v691_v7 = vpop.eup %690  ;;  %v228_v47 = vadd.s32 64, %v956_v29  ;;  %v237_v48 = vadd.s32 136, %v956_v29  ;;  %v227_v49 = vadd.s32 56, %v956_v29  ;;  %p776_p8 = scmp.lt.s32.totalorder %s774_s24, %s770_s20 }
  0x36   : > { %v205_v8 = vmul.f32 0.02, %v691_v7  ;;  %vm209_vm0 = vweird.f32 %v691_v7  ;;  %v236_v50 = vadd.s32 128, %v956_v29  ;;  %v226_v51 = vadd.s32 48, %v956_v29  ;;  %p772_p3 = pnand %p771_p1, %p906_p13 }
  0x37   : > { %692 = vrsqrt.f32 %v191_v6  ;;  %vm199_vm1 = vcmp.eq.f32.partialorder %v191_v6, inf  ;;  %v202_v18 = vand.u32 2147483648, %v191_v6  ;;  %vm201_vm2 = vcmp.eq.f32.partialorder %v191_v6, 0.0  ;;  %p777_p7 = por %p776_p8, %p775_p12 }
  0x38   : > { %v206_v10 = vsub.f32 1.0, %v205_v8  ;;  %v225_v52 = vadd.s32 40, %v956_v29  ;;  %v224_v53 = vadd.s32 32, %v956_v29  ;;  %v223_v55 = vadd.s32 24, %v956_v29  ;;  %p773_p5 = pneg %p772_p3 }
  0x39   : > { %v222_v56 = vadd.s32 16, %v956_v29  ;;  %v221_v57 = vadd.s32 8, %v956_v29 }
  0x3a   : > { %v207_v13 = vmul.f32 %v691_v7, %v206_v10  ;;  %p778_p9 = pnand %p777_p7, %p773_p5 }
  0x3c   : > { %v208_v16 = vadd.f32 %v691_v7, %v207_v13 }
  0x3d   : > { %v693_v9 = vpop.eup %692 }
  0x3e   : > { %v193_v11 = vmul.f32 %v693_v9, %v191_v6  ;;  %v210_v20 = vsel %vm209_vm0, %v691_v7, %v208_v16 }
  0x40   : > { %v194_v12 = vmul.f32 %v693_v9, %v193_v11 }
  0x42   : > { %v195_v14 = vmul.f32 0.5, %v194_v12 }
  0x44   : > { %v196_v15 = vsub.f32 1.5, %v195_v14 }
  0x46   : > { %v197_v17 = vmul.f32 %v693_v9, %v196_v15 }
  0x48   : > { %v198_v19 = vmul.f32 %v197_v17, %v191_v6 }
  0x4a   : > { %v200_v21 = vsel %vm199_vm1, %v191_v6, %v198_v19 }
  0x4b   : > { %v203_v22 = vsel %vm201_vm2, %v202_v18, %v200_v21 }
  0x4c   : > { %v949_v23 = vmul.f32 %v210_v20, %v203_v22 }
  0x4e   : > { %vm624_vm3 = vcmp.lt.s32.totalorder %v949_v23, 0  ;;  %v625_v25 = vceil.f32 %v949_v23  ;;  %v626_v26 = vfloor.f32 %v949_v23 }
  0x50   : > { %v627_v27 = vsel %vm624_vm3, %v625_v25, %v626_v26 }
  0x51   : > { %v954_v28 = vcvt.f32.s32 %v627_v27 }
  0x53   : > { %vm217_vm4 = vcmp.lt.s32.totalorder %v954_v28, 173  ;;  %v213_v61 = vcvt.s32.f32 %v954_v28 }
  0x54   : > { %v218_v30 = vsel %vm217_vm4, %v954_v28, 173 }
  0x55   : > { %v242_v31 = vperm.slane %v218_v30, 0  ;;  %v243_v32 = vperm.slane %v218_v30, 4  ;;  %v214_v62 = vadd.f32 1.0, %v213_v61  ;;  %v216_v1 = vsub.f32 %v949_v23, %v213_v61 }
  0x57   : > { %v962_v35 = vperm.slane %v242_v31, 0  ;;  %v964_v36 = vperm.slane %v243_v32, 0  ;;  %v215_v0 = vsub.f32 %v214_v62, %v949_v23  ;;  %v447_v5 = vperm.slane %v216_v1, 0 }
  0x58   : > { %v448_v14 = vperm.slane %v216_v1, 4 }
  0x59   : > { %vm276_vm5 = vcmp.eq.s32.totalorder %v235_v33, %v962_v35  ;;  %vm277_vm6 = vcmp.eq.s32.totalorder %v235_v33, %v964_v36  ;;  %vm274_vm7 = vcmp.eq.s32.totalorder %v234_v34, %v962_v35  ;;  %vm275_vm8 = vcmp.eq.s32.totalorder %v234_v34, %v964_v36 }
  0x5a   : > { %569 = vmatpush.msk.msra.mxu0 %vm276_vm5, %v830_v39  ;;  %593 = vmatpush.msk.msra.mxu2 %vm277_vm6, %v830_v39  ;;  %vm272_vm9 = vcmp.eq.s32.totalorder %v233_v37, %v962_v35  ;;  %vm273_vm10 = vcmp.eq.s32.totalorder %v233_v37, %v964_v36  ;;  %vm270_vm11 = vcmp.eq.s32.totalorder %v232_v38, %v962_v35  ;;  %v438_v4 = vperm.slane %v215_v0, 0 }
  0x5b   : > { %vm271_vm12 = vcmp.eq.s32.totalorder %v232_v38, %v964_v36  ;;  %vm268_vm13 = vcmp.eq.s32.totalorder %v231_v40, %v962_v35  ;;  %vm269_vm14 = vcmp.eq.s32.totalorder %v231_v40, %v964_v36  ;;  %vm288_vm15 = vcmp.eq.s32.totalorder %v241_v41, %v962_v35 }
  0x5c   : > { %570 = vmatpush.msk.msra.mxu0 %vm274_vm7, %v830_v39  ;;  %594 = vmatpush.msk.msra.mxu2 %vm275_vm8, %v830_v39  ;;  %vm289_vm0 = vcmp.eq.s32.totalorder %v241_v41, %v964_v36  ;;  %vm286_vm1 = vcmp.eq.s32.totalorder %v240_v42, %v962_v35  ;;  %vm287_vm2 = vcmp.eq.s32.totalorder %v240_v42, %v964_v36  ;;  %v442_v9 = vperm.slane %v438_v4, 0 }
  0x5d   : > { %vm266_vm3 = vcmp.eq.s32.totalorder %v230_v43, %v962_v35  ;;  %vm267_vm4 = vcmp.eq.s32.totalorder %v230_v43, %v964_v36  ;;  %585 = vmatpush.msk.msra.mxu1 %vm288_vm15, %v830_v39  ;;  %609 = vmatpush.msk.msra.mxu3 %vm289_vm0, %v830_v39  ;;  %vm284_vm5 = vcmp.eq.s32.totalorder %v239_v45, %v962_v35  ;;  %v451_v10 = vperm.slane %v447_v5, 0 }
  0x5e   : > { %571 = vmatpush.msk.msra.mxu0 %vm272_vm9, %v830_v39  ;;  %595 = vmatpush.msk.msra.mxu2 %vm273_vm10, %v830_v39  ;;  %vm285_vm6 = vcmp.eq.s32.totalorder %v239_v45, %v964_v36  ;;  %vm264_vm7 = vcmp.eq.s32.totalorder %v229_v44, %v962_v35  ;;  %vm265_vm8 = vcmp.eq.s32.totalorder %v229_v44, %v964_v36  ;;  %v439_v12 = vperm.slane %v215_v0, 4 }
  0x5f   : > { %586 = vmatpush.msk.msra.mxu1 %vm286_vm1, %v830_v39  ;;  %610 = vmatpush.msk.msra.mxu3 %vm287_vm2, %v830_v39  ;;  %vm282_vm9 = vcmp.eq.s32.totalorder %v238_v46, %v962_v35  ;;  %vm283_vm10 = vcmp.eq.s32.totalorder %v238_v46, %v964_v36  ;;  %vm260_vm15 = vcmp.eq.s32.totalorder %v227_v49, %v962_v35  ;;  %v452_v21 = vperm.slane %v448_v14, 0 }
  0x60   : > { %572 = vmatpush.msk.msra.mxu0 %vm270_vm11, %v830_v39  ;;  %596 = vmatpush.msk.msra.mxu2 %vm271_vm12, %v830_v39  ;;  %vm262_vm11 = vcmp.eq.s32.totalorder %v228_v47, %v962_v35  ;;  %vm263_vm12 = vcmp.eq.s32.totalorder %v228_v47, %v964_v36  ;;  %vm261_vm0 = vcmp.eq.s32.totalorder %v227_v49, %v964_v36  ;;  %v443_v19 = vperm.slane %v439_v12, 0 }
  0x61   : > { %587 = vmatpush.msk.msra.mxu1 %vm284_vm5, %v830_v39  ;;  %611 = vmatpush.msk.msra.mxu3 %vm285_vm6, %v830_v39  ;;  %vm278_vm1 = vcmp.eq.s32.totalorder %v236_v50, %v962_v35  ;;  %vm279_vm2 = vcmp.eq.s32.totalorder %v236_v50, %v964_v36  ;;  %vm338_vm5 = vcmask 392192   ;;  %vm256_vm6 = vcmp.eq.s32.totalorder %v225_v52, %v962_v35 }
  0x62   : > { %573 = vmatpush.msk.msra.mxu0 %vm268_vm13, %v830_v39  ;;  %597 = vmatpush.msk.msra.mxu2 %vm269_vm14, %v830_v39  ;;  %vm280_vm13 = vcmp.eq.s32.totalorder %v237_v48, %v962_v35  ;;  %vm281_vm14 = vcmp.eq.s32.totalorder %v237_v48, %v964_v36 }
  0x63   : > { %588 = vmatpush.msk.msra.mxu1 %vm282_vm9, %v830_v39  ;;  %612 = vmatpush.msk.msra.mxu3 %vm283_vm10, %v830_v39  ;;  %vm255_vm9 = vcmp.eq.s32.totalorder %v224_v53, %v964_v36  ;;  %vm252_vm10 = vcmp.eq.s32.totalorder %v223_v55, %v962_v35 }
  0x64   : > { %574 = vmatpush.msk.msra.mxu0 %vm266_vm3, %v830_v39  ;;  %598 = vmatpush.msk.msra.mxu2 %vm267_vm4, %v830_v39  ;;  %vm258_vm3 = vcmp.eq.s32.totalorder %v226_v51, %v962_v35  ;;  %vm259_vm4 = vcmp.eq.s32.totalorder %v226_v51, %v964_v36 }
  0x65   : > { %589 = vmatpush.msk.msra.mxu1 %vm280_vm13, %v830_v39  ;;  %613 = vmatpush.msk.msra.mxu3 %vm281_vm14, %v830_v39  ;;  %vm251_vm13 = vcmp.eq.s32.totalorder %v222_v56, %v964_v36  ;;  %vm248_vm14 = vcmp.eq.s32.totalorder %v221_v57, %v962_v35 }
  0x66   : > { %575 = vmatpush.msk.msra.mxu0 %vm264_vm7, %v830_v39  ;;  %599 = vmatpush.msk.msra.mxu2 %vm265_vm8, %v830_v39  ;;  %vm257_vm7 = vcmp.eq.s32.totalorder %v225_v52, %v964_v36  ;;  %vm254_vm8 = vcmp.eq.s32.totalorder %v224_v53, %v962_v35 }
  0x67   : > { %590 = vmatpush.msk.msra.mxu1 %vm278_vm1, %v830_v39  ;;  %614 = vmatpush.msk.msra.mxu3 %vm279_vm2, %v830_v39  ;;  %vm247_vm1 = vcmp.eq.s32.totalorder %v956_v29, %v964_v36 }
  0x68   : > { %576 = vmatpush.msk.msra.mxu0 %vm262_vm11, %v830_v39  ;;  %600 = vmatpush.msk.msra.mxu2 %vm263_vm12, %v830_v39  ;;  %vm253_vm11 = vcmp.eq.s32.totalorder %v223_v55, %v964_v36  ;;  %vm250_vm12 = vcmp.eq.s32.totalorder %v222_v56, %v962_v35 }
  0x69   : > { %591 = vmatmul.msk.f32.vlgmr.msra.gmra.mxu1 %vm338_vm5, %v335_v54  ;;  %615 = vmatmul.msk.f32.vlgmr.msra.gmra.mxu3 %vm338_vm5, %v335_v54 }
  0x6a   : > { %577 = vmatpush.msk.msra.mxu0 %vm260_vm15, %v830_v39  ;;  %601 = vmatpush.msk.msra.mxu2 %vm261_vm0, %v830_v39  ;;  %vm249_vm15 = vcmp.eq.s32.totalorder %v221_v57, %v964_v36  ;;  %vm246_vm0 = vcmp.eq.s32.totalorder %v956_v29, %v962_v35 }
  0x6c   : > { %578 = vmatpush.msk.msra.mxu0 %vm258_vm3, %v830_v39  ;;  %602 = vmatpush.msk.msra.mxu2 %vm259_vm4, %v830_v39 }
  0x6e   : > { %579 = vmatpush.msk.msra.mxu0 %vm256_vm6, %v830_v39  ;;  %603 = vmatpush.msk.msra.mxu2 %vm257_vm7, %v830_v39 }
  0x70   : > { %580 = vmatpush.msk.msra.mxu0 %vm254_vm8, %v830_v39  ;;  %604 = vmatpush.msk.msra.mxu2 %vm255_vm9, %v830_v39 }
  0x71   : > { %592 = vmatmul.msk.f32.gmra.mxu1 %vm338_vm5, %v337_v58  ;;  %616 = vmatmul.msk.f32.gmra.mxu3 %vm338_vm5, %v337_v58 }
  0x72   : > { %581 = vmatpush.msk.msra.mxu0 %vm252_vm10, %v830_v39  ;;  %605 = vmatpush.msk.msra.mxu2 %vm253_vm11, %v830_v39 }
  0x74   : > { %582 = vmatpush.msk.msra.mxu0 %vm250_vm12, %v830_v39  ;;  %606 = vmatpush.msk.msra.mxu2 %vm251_vm13, %v830_v39 }
  0x76   : > { %583 = vmatpush.msk.msra.mxu0 %vm248_vm14, %v830_v39  ;;  %607 = vmatpush.msk.msra.mxu2 %vm249_vm15, %v830_v39 }
  0x78   : > { %584 = vmatpush.msk.msra.mxu0 %vm246_vm0, %v830_v39  ;;  %608 = vmatpush.msk.msra.mxu2 %vm247_vm1, %v830_v39 }
  0x79   : > { %361 = vmatmul.f32.vlgmr.msra.gmra.mxu0 %v334_v59  ;;  %407 = vmatmul.f32.vlgmr.msra.gmra.mxu2 %v334_v59 }
  0x81   : > { %364 = vmatmul.f32.gmra.mxu0 %v336_v60  ;;  %410 = vmatmul.f32.gmra.mxu2 %v336_v60 }
  0xe6   : > { %v385_v63 = vpop.f32.mrf.mxu1 }
  0xec   : > { %v431_v3 = vpop.f32.mrf.mxu3 }
  0xee   : > { %v388_v7 = vpop.f32.mrf.mxu1 }
  0xf4   : > { %v434_v17 = vpop.f32.mrf.mxu3 }
  0xf6   : > { %v362_v2 = vpop.f32.mrf.mxu0 }
  0xf7   : > { %v386_v8 = vadd.f32 %v385_v63, %v362_v2 }
  0xf9   : > { %v444_v15 = vmul.f32 %v442_v9, %v386_v8 }
  0xfc   : > { %v408_v6 = vpop.f32.mrf.mxu2 }
  0xfd   : > { %v432_v18 = vadd.f32 %v431_v3, %v408_v6 }
  0xfe   : > { %v365_v11 = vpop.f32.mrf.mxu0 }
  0xff   : > { %v389_v13 = vadd.f32 %v388_v7, %v365_v11  ;;  %v445_v24 = vmul.f32 %v443_v19, %v432_v18 }
 0x101   : > { %v453_v16 = vmul.f32 %v451_v10, %v389_v13 }
 0x103   : > { %v455_v20 = vadd.f32 %v453_v16, %v444_v15 }
 0x104   : > { %v411_v22 = vpop.f32.mrf.mxu2 }
 0x105   : > { %v435_v23 = vadd.f32 %v434_v17, %v411_v22  ;;  %457 = vst [vmem:[%s178_s14] sm:$0xff] %v455_v20 }
 0x107   : > { %v454_v25 = vmul.f32 %v452_v21, %v435_v23 }
 0x109   : > { %v456_v26 = vadd.f32 %v454_v25, %v445_v24 }
 0x10b   : > { %458 = vst [vmem:[%s178_s14 + $0x8] sm:$0xff] %v456_v26 }
 0x10c   : > { %781 = shalt.err (!%p778_p9)
}
 0x10d   : > { %635 = dma.vmem_to_hbm [thread:$0]  (%p906_p13), %s474_s15, 256, %s476_s18, %s460_s16  }
 0x10e PF: > { %s487_s29 = sand.u32 1, %s812_s9   ;;  %p1132_p10 = scmp.ge.s32.totalorder %s824_s12, 2 }
 0x10f   : > { %s488_s4 = scalar_lea.sflag [#allocation4], %s487_s29 }
 0x110   : > { %p646_p11 = pnand %p1132_p10, %p911_p4 }
 0x112   : > { %p647_p0 = pneg %p646_p11 }
 0x114   : > { %807 = dma.done.wait (%p647_p0), %s488_s4, 256  }
 0x115   : > { %809 = vsyncadd (%p647_p0), %s488_s4, 4294967040  ;;  %p16_p2 = scmp.ge.s32.totalorder %s886_s23, 4   ;;  %s1133_s9 = smov %s816_s10 }
 0x116   : > { %s1134_s10 = smov %s820_s11  ;;  %s1135_s11 = smov %s898_s26 }
 0x117   : > { %s1136_s12 = smov %s886_s23  ;;  %18 = sbr.rel (!%p16_p2) target bundleno = 6 (0x6), region = 77 }
 0x11c   :  { %494 = vsyncpa [#allocation3], 1 }
 0x11d   :  { %496 = vsyncpa [#allocation3 + $0x1], 1 }
 0x11e   :  { %497 = vsyncpa [#allocation6], 1 }
 0x11f   :  { %498 = vsyncpa [#allocation4], 1 }
 0x120   :  { %500 = vsyncpa [#allocation4 + $0x1], 1 }

</bundles_post_ra>
